<compile_context>
chip_gen: v5e
topology: v5e:2x2
jax: 0.10.0
libtpu: 0.0.40
codegen_flags: <defaults>
</compile_context>

<pallas_src>
import functools

import jax
import jax.numpy as jnp
from jax.experimental import pallas as pl
from jax.experimental.pallas import tpu as pltpu


def _round_up(x, m):
    return (x + m - 1) // m * m


def _sublane_multiple(dtype):
    # Minimum second-to-last tile dim: 8 for 4-byte, 16 for 2-byte, 32 for 1-byte.
    return max(8, 32 // jnp.dtype(dtype).itemsize)


# ------------------- small-table path: VMEM-resident lookup -------------------

def _onehot_lookup_kernel(ids_ref, table_ref, out_ref):
    """out[i] = table[ids[i]] via a one-hot (rows,V)@(V,E) MXU matmul.

    ids_ref  : (1, rows, 1) int32 block
    table_ref: (V, E) full table, resident in VMEM (constant index_map)
    out_ref  : (rows, E) output tile
    """
    rows = out_ref.shape[0]
    V = table_ref.shape[0]
    ids = ids_ref[0]                                             # (rows, 1) int32
    iota = jax.lax.broadcasted_iota(jnp.int32, (rows, V), 1)
    onehot = (ids == iota).astype(table_ref.dtype)               # (rows, V)
    out_ref[...] = jnp.dot(onehot, table_ref[...],
                           preferred_element_type=jnp.float32).astype(out_ref.dtype)


def _lookup_small_vmem(table, flat_ids, block_rows=512):
    V, E = table.shape
    n = flat_ids.shape[0]
    itemsize = jnp.dtype(table.dtype).itemsize
    mult = _sublane_multiple(table.dtype)

    r = min(_round_up(block_rows, mult), _round_up(n, mult))
    n_blocks = -(-n // r)
    n_pad = n_blocks * r
    tail = n_pad - n
    if tail:
        flat_ids = jnp.concatenate([flat_ids, jnp.zeros((tail,), jnp.int32)])
    ids3 = flat_ids.reshape(n_blocks, r, 1)

    out = pl.pallas_call(
        _onehot_lookup_kernel,
        out_shape=jax.ShapeDtypeStruct((n_pad, E), table.dtype),
        grid=(n_blocks,),
        in_specs=[pl.BlockSpec((1, r, 1), lambda i: (i, 0, 0)),
                  pl.BlockSpec((V, E), lambda i: (0, 0))],   # whole table in VMEM
        out_specs=pl.BlockSpec((r, E), lambda i: (i, 0)),
        compiler_params=pltpu.CompilerParams(
            dimension_semantics=("parallel",),
            vmem_limit_bytes=32 << 20),
        cost_estimate=pl.CostEstimate(
            flops=2 * n_pad * V * E, transcendentals=0,
            bytes_accessed=V * E * itemsize + n_pad * (E * itemsize + 4)),
    )(ids3, table)
    return out[:n] if tail else out


# ------------------- large-table path: HBM row gather (DMA) -------------------

def _gather_rows_kernel(ids_ref, table_hbm, out_ref, sem_ref, *,
                        rows_per_block, n_blocks, tail_rows):
    """Gather rows of `table_hbm` (HBM) into the (rows_per_block, E) VMEM output.

    ids_ref  : (n_pad,) int32 scalar-prefetched into SMEM
    table_hbm: (V, E) table left in HBM (memory_space=pl.ANY)
    out_ref  : (rows_per_block, E) output tile in VMEM
    sem_ref  : (1,) shared DMA semaphore; all row copies signal it, completion is
               observed with ONE aggregated wait (descriptor only supplies bytes).
    """
    r = rows_per_block
    blk = pl.program_id(0)
    base = blk * r
    sem = sem_ref.at[0]

    def gather(nrows):
        @pl.loop(0, nrows)
        def _(i):
            pltpu.make_async_copy(table_hbm.at[ids_ref[base + i]],
                                  out_ref.at[i], sem).start()
        # nrows row-copies of E elements each == the (nrows, E) slab below.
        pltpu.make_async_copy(out_ref.at[pl.ds(0, nrows)],
                              out_ref.at[pl.ds(0, nrows)], sem).wait()

    if tail_rows == r:                   # token count divides the block size
        gather(r)
    else:
        @pl.when(blk < n_blocks - 1)
        def _():
            gather(r)

        @pl.when(blk == n_blocks - 1)
        def _():
            # Skip dead DMAs for padded tail rows; zero them instead (sliced off).
            gather(tail_rows)
            out_ref[pl.ds(tail_rows, r - tail_rows), :] = jnp.zeros(
                (r - tail_rows, out_ref.shape[1]), out_ref.dtype)


def _lookup_gather_hbm(table, flat_ids, rows_per_block):
    V, E = table.shape
    n = flat_ids.shape[0]
    itemsize = jnp.dtype(table.dtype).itemsize
    mult = _sublane_multiple(table.dtype)

    # Large blocks amortize per-step overhead; cap the double-buffered output tile
    # at 16 MiB so it fits the scoped-VMEM budget on v5e/v6e/v7x.
    r = min(_round_up(int(rows_per_block), mult), _round_up(n, mult))
    r_cap = max(mult, ((16 << 20) // (2 * E * itemsize)) // mult * mult)
    r = min(r, r_cap)
    n_blocks = -(-n // r)
    n_pad = n_blocks * r
    tail_rows = n - (n_blocks - 1) * r
    if n_pad != n:
        flat_ids = jnp.concatenate([flat_ids, jnp.zeros((n_pad - n,), jnp.int32)])

    kernel = functools.partial(_gather_rows_kernel, rows_per_block=r,
                               n_blocks=n_blocks, tail_rows=tail_rows)

    out = pl.pallas_call(
        kernel,
        out_shape=jax.ShapeDtypeStruct((n_pad, E), table.dtype),
        grid_spec=pltpu.PrefetchScalarGridSpec(
            num_scalar_prefetch=1,
            grid=(n_blocks,),
            in_specs=[pl.BlockSpec(memory_space=pl.ANY)],      # table stays in HBM
            out_specs=pl.BlockSpec((r, E), lambda i, ids: (i, 0)),
            scratch_shapes=[pltpu.SemaphoreType.DMA((1,))],
        ),
        compiler_params=pltpu.CompilerParams(
            dimension_semantics=("parallel",),                 # v7x: 2 TCs split blocks
            vmem_limit_bytes=32 << 20),
        cost_estimate=pl.CostEstimate(
            flops=0, transcendentals=0,
            bytes_accessed=2 * n * E * itemsize + n_pad * 4),
    )(flat_ids, table)
    return out[:n] if n_pad != n else out


# --------------------------------- dispatch ------------------------------------

def embed_lookup(table, ids, rows_per_block=512, small_vocab_max=512,
                 small_table_bytes=4 << 20):
    """table: (V, E), ids: int array of any shape -> embeddings ids.shape + (E,)."""
    V, E = table.shape
    ids_shape = ids.shape
    flat = ids.reshape(-1).astype(jnp.int32)
    n = flat.shape[0]
    if n == 0:
        return jnp.zeros((*ids_shape, E), table.dtype)
    table_bytes = V * E * jnp.dtype(table.dtype).itemsize
    if V <= small_vocab_max and table_bytes <= small_table_bytes:
        out = _lookup_small_vmem(table, flat)
    else:
        out = _lookup_gather_hbm(table, flat, rows_per_block)
    return out.reshape(*ids_shape, E)


# ------------------------------ EmbeddingLayer ----------------------------------

def init_params(key, embed_size, code_vocab_size, action_vocab_size, nl_vocab_size,
                mix_vocab=False, padding_idx=0):
    """nn.Embedding default init N(0,1), with the padding_idx row zeroed."""
    k_nl, k_act, k_code = jax.random.split(key, 3)

    def emb(k, v):
        w = jax.random.normal(k, (v, embed_size), jnp.float32)
        return w.at[padding_idx].set(0.0)

    nl = emb(k_nl, nl_vocab_size)
    return {
        "nl_embed": nl,
        "action_embed": emb(k_act, action_vocab_size),
        "code_embed": nl if mix_vocab else emb(k_code, code_vocab_size),
    }


def embedding_layer_forward(params, old_token_tensor, new_token_tensor,
                            action_tensor, nl_tensor):
    """Matches EmbeddingLayer.forward: four embedding lookups."""
    code_tbl = params["code_embed"]
    nl_tbl = params["nl_embed"]
    E = nl_tbl.shape[1]

    old_flat = old_token_tensor.reshape(-1)
    new_flat = new_token_tensor.reshape(-1)
    n_old, n_new = old_flat.shape[0], new_flat.shape[0]

    if code_tbl is nl_tbl:
        # mix_vocab: code and nl share one table -> fuse all three lookups.
        nl_flat = nl_tensor.reshape(-1)
        ems = embed_lookup(code_tbl, jnp.concatenate([old_flat, new_flat, nl_flat]))
        old_ems = ems[:n_old].reshape(*old_token_tensor.shape, E)
        new_ems = ems[n_old:n_old + n_new].reshape(*new_token_tensor.shape, E)
        nl_ems = ems[n_old + n_new:].reshape(*nl_tensor.shape, E)
    else:
        # old/new token lookups share the code table -> fuse into one call.
        code_ems = embed_lookup(code_tbl, jnp.concatenate([old_flat, new_flat]))
        old_ems = code_ems[:n_old].reshape(*old_token_tensor.shape, E)
        new_ems = code_ems[n_old:].reshape(*new_token_tensor.shape, E)
        nl_ems = embed_lookup(nl_tbl, nl_tensor)

    action_ems = embed_lookup(params["action_embed"], action_tensor)
    return old_ems, new_ems, action_ems, nl_ems


# ----------------------------------- main ---------------------------------------

if __name__ == "__main__":
    T, B, E = 8, 2, 32
    code_V, act_V, nl_V = 40, 8, 50

    key = jax.random.PRNGKey(0)
    pkey, dkey, tkey = jax.random.split(key, 3)
    params = init_params(pkey, E, code_V, act_V, nl_V, mix_vocab=False, padding_idx=0)

    ks = jax.random.split(dkey, 4)
    old_tok = jax.random.randint(ks[0], (T, B), 1, code_V, jnp.int32)
    new_tok = jax.random.randint(ks[1], (T, B), 1, code_V, jnp.int32)
    act_tok = jax.random.randint(ks[2], (T, B), 1, act_V, jnp.int32)
    nl_tok = jax.random.randint(ks[3], (T, B), 1, nl_V, jnp.int32)
    # exercise the zeroed padding_idx row
    old_tok = old_tok.at[-1, :].set(0)
    nl_tok = nl_tok.at[-2:, 1].set(0)

    outs = embedding_layer_forward(params, old_tok, new_tok, act_tok, nl_tok)
    outs = jax.block_until_ready(outs)
    old_e, new_e, act_e, nl_e = outs

    assert old_e.shape == (T, B, E)
    assert new_e.shape == (T, B, E)
    assert act_e.shape == (T, B, E)
    assert nl_e.shape == (T, B, E)

    # reference check against a plain table[ids] gather
    assert jnp.allclose(old_e, params["code_embed"][old_tok])
    assert jnp.allclose(new_e, params["code_embed"][new_tok])
    assert jnp.allclose(act_e, params["action_embed"][act_tok])
    assert jnp.allclose(nl_e, params["nl_embed"][nl_tok])
    # padding_idx rows are exactly zero
    assert jnp.all(old_e[-1, :, :] == 0.0)
    assert jnp.all(nl_e[-2:, 1, :] == 0.0)

    # mix_vocab=True: shared code/nl table -> fused single-launch lookup
    params_mix = init_params(pkey, E, code_V, act_V, nl_V, mix_vocab=True, padding_idx=0)
    m_old, m_new, m_act, m_nl = jax.block_until_ready(
        embedding_layer_forward(params_mix, old_tok, new_tok, act_tok, nl_tok))
    assert jnp.allclose(m_old, params_mix["code_embed"][old_tok])
    assert jnp.allclose(m_new, params_mix["code_embed"][new_tok])
    assert jnp.allclose(m_act, params_mix["action_embed"][act_tok])
    assert jnp.allclose(m_nl, params_mix["nl_embed"][nl_tok])

    # large-vocab table exercises the HBM row-gather (DMA) path, incl. multi-block
    # grid and the static last-block tail branch (200 rows, blocks of 64).
    big_V, big_E = 2048, 256
    big_tbl = jax.random.normal(tkey, (big_V, big_E), jnp.float32).at[0].set(0.0)
    big_ids = jax.random.randint(jax.random.PRNGKey(7), (200,), 0, big_V, jnp.int32)
    big_ids = big_ids.at[3].set(0)  # padding row
    big_out = jax.block_until_ready(embed_lookup(big_tbl, big_ids, rows_per_block=64))
    assert big_out.shape == (200, big_E)
    assert jnp.array_equal(big_out, big_tbl[big_ids])
    assert jnp.all(big_out[3] == 0.0)

    print("KERNEL_OK")
</pallas_src>

<mosaic_0001>
module attributes {stable_mosaic.version = 11 : i64} {
  func.func @_onehot_lookup_kernel(%arg0: i32, %arg1: memref<1x32x1xi32, #tpu.memory_space<vmem>>, %arg2: memref<40x32xf32, #tpu.memory_space<vmem>>, %arg3: memref<32x32xf32, #tpu.memory_space<vmem>>) attributes {dimension_semantics = [#tpu.dimension_semantics<parallel>], iteration_bounds = array<i64: 1>, scalar_prefetch = 0 : i64, scratch_operands = 0 : i64, tpu.core_type = #tpu.core_type<tc>, window_params = [{transform_indices = @transform_0, window_bounds = array<i64: 1, 32, 1>}, {pipeline_mode = #tpu.pipeline_mode<synchronous>, transform_indices = @transform_1, window_bounds = array<i64: 40, 32>}, {transform_indices = @transform_2, window_bounds = array<i64: 32, 32>}]} {
    %c0 = arith.constant 0 : index
    %c0_0 = arith.constant 0 : index
    %c0_1 = arith.constant 0 : index
    %0 = vector.load %arg1[%c0, %c0_0, %c0_1] : memref<1x32x1xi32, #tpu.memory_space<vmem>>, vector<1x32x1xi32>
    %1 = vector.shape_cast %0 : vector<1x32x1xi32> to vector<32x1xi32>
    %2 = tpu.iota {dimensions = array<i32: 1>} : vector<32x40xi32>
    %3 = vector.broadcast %1 : vector<32x1xi32> to vector<32x40xi32>
    %4 = arith.cmpi eq, %3, %2 : vector<32x40xi32>
    %5 = arith.extui %4 : vector<32x40xi1> to vector<32x40xi32>
    %6 = arith.sitofp %5 : vector<32x40xi32> to vector<32x40xf32>
    %c0_2 = arith.constant 0 : index
    %c0_3 = arith.constant 0 : index
    %7 = vector.load %arg2[%c0_2, %c0_3] : memref<40x32xf32, #tpu.memory_space<vmem>>, vector<40x32xf32>
    %cst = arith.constant dense<0.000000e+00> : vector<32x32xf32>
    %8 = tpu.matmul %6, %7, %cst {dimension_numbers = #tpu.dot_dimension_numbers<[1], [0], [0], [1], [0, 0, 1, 1], [], []>} : vector<32x40xf32>, vector<40x32xf32>, vector<32x32xf32> -> vector<32x32xf32>
    %c0_4 = arith.constant 0 : index
    %c0_5 = arith.constant 0 : index
    %9 = vector.load %arg3[%c0_4, %c0_5] : memref<32x32xf32, #tpu.memory_space<vmem>>, vector<32x32xf32>
    tpu.vector_store %arg3[%c0_4, %c0_5], %8 {strides = array<i32>} : memref<32x32xf32, #tpu.memory_space<vmem>>, vector<32x32xf32>,
    return
  }
  func.func @transform_0(%arg0: i32) -> (i32, i32, i32) {
    %c0_i32 = arith.constant 0 : i32
    %c0_i32_0 = arith.constant 0 : i32
    %c0_i32_1 = arith.constant 0 : i32
    return %arg0, %c0_i32, %c0_i32_0 : i32, i32, i32
  }
  func.func @transform_1(%arg0: i32) -> (i32, i32) {
    %c0_i32 = arith.constant 0 : i32
    %c0_i32_0 = arith.constant 0 : i32
    %c0_i32_1 = arith.constant 0 : i32
    return %c0_i32, %c0_i32_0 : i32, i32
  }
  func.func @transform_2(%arg0: i32) -> (i32, i32) {
    %c0_i32 = arith.constant 0 : i32
    %c0_i32_0 = arith.constant 0 : i32
    return %arg0, %c0_i32 : i32, i32
  }
}

</mosaic_0001>

<bundles_post_ra>
// kernel: tpu_custom_call.1
= control target key start
LH: loop header
LB: loop body
LE: loop exit
PB: predicated region body
PF: predicated region fallthrough
CT: control target
= control target key end

     0   :  { %v168_v2 = vmov 0   ;;  %s218_s0 = inlined_call_operand.vmem [shape: s32[1,32,1], index: 0, kind: input, shape index: {}]   ;;  %s219_s1 = inlined_call_operand.vmem [shape: f32[40,32], index: 1, kind: input, shape index: {}]   ;;  %s220_s2 = inlined_call_operand.hbm [shape: f32[32,32], index: 2, kind: output, shape index: {}]  }
   0x1   :  { %v14_v0 = vld [vmem:[%s218_s0 + $0x10] sm:$0xff]  ;;  %v12_v1 = vld [vmem:[%s218_s0] sm:$0xff]  ;;  %141 = vset.pattern.permute.xlu1 %v168_v2  ;;  %140 = vset.pattern.permute.xlu0 %v168_v2  ;;  %v45_v4 = vld [vmem:[%s219_s1 + $0x18] sm:$0xff] }
   0x2   :  { %v46_v3 = vld [vmem:[%s219_s1 + $0x20] sm:$0xff]  ;;  %25 = vperm.xlu0 %140, %v14_v0   ;;  %19 = vperm.xlu1 %141, %v12_v1  }
   0x3   :  { %7 = vsyncpa [#allocation3], 0  ;;  %121 = vmatpush.msra.mxu2 %v46_v3  ;;  %71 = vmatpush.msra.mxu0 %v46_v3  ;;  %v44_v5 = vld [vmem:[%s219_s1 + $0x10] sm:$0xff]  ;;  %v43_v6 = vld [vmem:[%s219_s1 + $0x8] sm:$0xff]  ;;  %v16_v10 = vlaneseq  ;;  %vm47_vm0 = vcmask 326656   ;;  %v169_v14 = vmov 0.0  }
   0x4   :  { %120 = vmatpush.msra.mxu1 %v46_v3  ;;  %122 = vmatpush.msra.mxu3 %v46_v3  ;;  %v15_v7 = vld [vmem:[%s218_s0 + $0x18] sm:$0xff]  ;;  %v13_v8 = vld [vmem:[%s218_s0 + $0x8] sm:$0xff]  ;;  %v42_v9 = vld [vmem:[%s219_s1] sm:$0xff]  ;;  %vm89_vm5 = vcmask 261120   ;;  %s170_s0 = smov [#allocation2]   ;;  %s100_s29 = sshll.u32 %s220_s2, 4  ;;  %s101_s29 = int_to_ptr.hbm [resolvable:$true] %s100_s29 }
   0x5   :  { %124 = vmatpush.msra.mxu2 %v45_v4  ;;  %72 = vmatpush.msra.mxu0 %v45_v4  ;;  %v17_v11 = vand.u32 127, %v16_v10  ;;  %s98_s1 = sshll.u32 %s170_s0, 4  ;;  %s171_s30 = smov 128   ;;  %s99_s1 = int_to_ptr.vmem [resolvable:$true] %s98_s1 }
   0x6   :  { %123 = vmatpush.msra.mxu1 %v45_v4  ;;  %125 = vmatpush.msra.mxu3 %v45_v4  ;;  %s172_s3 = smov 8  }
   0x7   :  { %127 = vmatpush.msra.mxu2 %v44_v5  ;;  %73 = vmatpush.msra.mxu0 %v44_v5 }
   0x8   :  { %126 = vmatpush.msra.mxu1 %v44_v5  ;;  %128 = vmatpush.msra.mxu3 %v44_v5 }
   0x9   :  { %130 = vmatpush.msra.mxu2 %v43_v6  ;;  %74 = vmatpush.msra.mxu0 %v43_v6 }
   0xa   :  { %28 = vperm.xlu0 %140, %v15_v7   ;;  %22 = vperm.xlu1 %141, %v13_v8  }
   0xb   :  { %129 = vmatpush.msra.mxu1 %v43_v6  ;;  %131 = vmatpush.msra.mxu3 %v43_v6 }
   0xc   :  { %133 = vmatpush.msra.mxu2 %v42_v9  ;;  %75 = vmatpush.msra.mxu0 %v42_v9 }
   0xd   :  { %132 = vmatpush.msra.mxu1 %v42_v9  ;;  %134 = vmatpush.msra.mxu3 %v42_v9 }
  0x74   :  { %v26_v12 = vpop.permute.xlu0 %25  ;;  %v20_v13 = vpop.permute.xlu1 %19 }
  0x75   :  { %vm32_vm1 = vcmp.eq.s32.totalorder %v26_v12, %v17_v11  ;;  %vm30_vm2 = vcmp.eq.s32.totalorder %v20_v13, %v17_v11 }
  0x76   :  { %v114_v15 = vsel %vm32_vm1, 1.0, %v169_v14  ;;  %v112_v16 = vsel %vm30_vm2, 1.0, %v169_v14 }
  0x77   :  { %118 = vmatmul.msk.f32.vlgmr.msra.gmra.mxu2 %vm47_vm0, %v114_v15  ;;  %116 = vmatmul.msk.f32.vlgmr.msra.gmra.mxu0 %vm47_vm0, %v112_v16 }
  0x7c   :  { %v29_v17 = vpop.permute.xlu0 %28  ;;  %v23_v18 = vpop.permute.xlu1 %22 }
  0x7d   :  { %vm33_vm3 = vcmp.eq.s32.totalorder %v29_v17, %v17_v11  ;;  %vm31_vm4 = vcmp.eq.s32.totalorder %v23_v18, %v17_v11 }
  0x7e   :  { %v115_v19 = vsel %vm33_vm3, 1.0, %v169_v14  ;;  %v113_v20 = vsel %vm31_vm4, 1.0, %v169_v14 }
  0x7f   :  { %117 = vmatmul.msk.f32.vlgmr.msra.gmra.mxu1 %vm47_vm0, %v113_v20  ;;  %119 = vmatmul.msk.f32.vlgmr.msra.gmra.mxu3 %vm47_vm0, %v115_v19 }
  0xf4   :  { %v77_v21 = vpop.f32.mrf.mxu0 }
  0xf5   :  { %90 = vst.msk [vmem:[#allocation2] sm:$0xff] %vm89_vm5, %v77_v21 }
  0xfa   :  { %v83_v22 = vpop.f32.mrf.mxu2 }
  0xfb   :  { %92 = vst.msk [vmem:[#allocation2 + $0x10] sm:$0xff] %vm89_vm5, %v83_v22 }
  0xfc   :  { %v80_v23 = vpop.f32.mrf.mxu1 }
  0xfd   :  { %91 = vst.msk [vmem:[#allocation2 + $0x8] sm:$0xff] %vm89_vm5, %v80_v23 }
 0x102   :  { %v86_v24 = vpop.f32.mrf.mxu3 }
 0x103   :  { %93 = vst.msk [vmem:[#allocation2 + $0x18] sm:$0xff] %vm89_vm5, %v86_v24 }
 0x104   :  { %106 = dma.vmem_to_hbm [thread:$0]  %s99_s1, 512, %s101_s29, [#allocation3], %s171_s30, %s171_s30, %s172_s3  }
 0x105   :  { %166 = dma.done.wait [#allocation3], 512  }
 0x106   :  { %167 = vsyncadd [#allocation3], 4294966784 }
 0x107   :  { %111 = vsyncpa [#allocation3], 1 }

</bundles_post_ra>
